<compile_context>
chip_gen: v7x
topology: tpu7x:2x2x1
jax: 0.10.0
libtpu: 0.0.40
codegen_flags: <defaults>
</compile_context>

<pallas_src>
import jax
import jax.numpy as jnp
from jax.experimental import pallas as pl
from jax.experimental.pallas import tpu as pltpu


def _leaky_relu(x, negative_slope=0.2):
    return jnp.where(x >= 0, x, negative_slope * x)


def _round_up(x, m):
    return (x + m - 1) // m * m


# --------------------------------------------------------------------------
# Kernel
# --------------------------------------------------------------------------
def _time_disc_kernel(x_ref, w1_ref, b1_ref, w2_ref, b2_ref, w3_ref, b3_ref,
                      out_ref):
    """Fused 3-layer MLP: (Linear -> LeakyReLU) x2 -> Linear(., 1)."""
    # Cast to bf16 in-kernel (free VPU work under the MXU); no-op if the
    # wrapper already handed us a padded bf16 tile.
    x = x_ref[...].astype(jnp.bfloat16)                   # [TB, in_pad]

    # Layer 1: Linear(input_dim, hidden) + LeakyReLU(0.2)  (MXU, f32 acc).
    h1 = jnp.dot(x, w1_ref[...], preferred_element_type=jnp.float32)
    h1 = _leaky_relu(h1 + b1_ref[...])                    # f32 elementwise

    # (Dropout(0.5) is identity at inference.)

    # Layer 2: Linear(hidden, hidden) + LeakyReLU(0.2)     (bf16 ops, f32 acc).
    h2 = jnp.dot(h1.astype(jnp.bfloat16), w2_ref[...],
                 preferred_element_type=jnp.float32)
    h2 = _leaky_relu(h2 + b2_ref[...])                    # f32 elementwise

    # Layer 3: Linear(hidden, 1) as a VPU multiply + XLU lane reduction
    # (an N=1 MXU pass would waste >99% of the array).
    out = jnp.sum(h2 * w3_ref[...], axis=-1, keepdims=True) + b3_ref[...]

    # Narrow (TB, 1) store: 4 B/row HBM writeback (no slab broadcast).
    out_ref[...] = out.astype(out_ref.dtype)


# --------------------------------------------------------------------------
# Wrapper helpers
# --------------------------------------------------------------------------
def _const_spec(shape):
    """Resident operand: constant block index, single-buffered."""
    try:
        return pl.BlockSpec(shape, lambda i: (0, 0),
                            pipeline_mode=pl.Buffered(1))
    except TypeError:
        # Older JAX without pipeline_mode on BlockSpec: fall back to default
        # (double-buffered) resident blocks.
        return pl.BlockSpec(shape, lambda i: (0, 0))


def _vmem_capacity_bytes():
    try:
        return int(pltpu.get_tpu_info().vmem_capacity_bytes)
    except Exception:
        return 64 << 20  # conservative (v7x-sized) fallback


def _select_batch_tile(batch, in_pad, hid_pad, x_bytes, vmem_capacity):
    """Pick the batch tile + vmem limit from a generation-aware budget."""
    # v5e / v6e: 128 MiB physical VMEM -> ~64 MiB working-set budget.
    # v7x: 64 MiB physical VMEM -> ~24 MiB working-set budget.
    budget = (64 << 20) if vmem_capacity >= (96 << 20) else (24 << 20)

    # Resident weight/bias footprint (single-buffered via pl.Buffered(1)).
    weights_bytes = ((in_pad + hid_pad) * hid_pad * 2      # bf16 w1, w2
                     + (3 * hid_pad + 1) * 4)              # f32 b1, b2, w3, b3
    tile_budget = budget - weights_bytes

    # Per-row cost of a batch tile: double-buffered x stream, streamed (tb,1)
    # output (negligible) and the live f32 h1/h2/(h2*w3) intermediates.
    per_row = 2 * in_pad * x_bytes + 2 * 4 + 3 * hid_pad * 4

    tb = 0
    for cand in (1024, 512, 256, 128, 64, 32, 16, 8):
        if cand * per_row <= tile_budget:
            tb = cand
            break
    if tb == 0:
        # Weights alone blow the budget.
        # TODO(synk): K-tile w2 (extra grid axis + f32 VMEM accumulator with
        # pl.when init/finalize) instead of shrinking tb to 8.
        tb = 8

    # Never make the tile larger than the (padded) batch.
    tb = min(tb, _round_up(batch, 8))
    # Keep >= 2 grid steps for mid/large batches so both v7x TensorCores get
    # work from the "parallel" batch axis (cheap on single-core chips).
    if batch >= 256:
        tb = min(tb, _round_up((batch + 1) // 2, 8))

    working_set = weights_bytes + tb * per_row
    vmem_limit = int(min(max(2 * working_set, 32 << 20),
                         (vmem_capacity * 3) // 4))
    return tb, vmem_limit


def prepare_params(params):
    """Pad + cast TimeDiscriminator weights once (hoisted out of the per-call
    path so repeated forward() calls don't re-pay an HBM pass over weights)."""
    if params.get("prepared", False):
        return params
    input_dim, hidden = params["w1"].shape
    in_pad = _round_up(input_dim, 128)
    hid_pad = _round_up(hidden, 128)
    w1 = jnp.pad(params["w1"], ((0, in_pad - input_dim),
                                (0, hid_pad - hidden))).astype(jnp.bfloat16)
    w2 = jnp.pad(params["w2"], ((0, hid_pad - hidden),
                                (0, hid_pad - hidden))).astype(jnp.bfloat16)
    b1 = jnp.pad(params["b1"], (0, hid_pad - hidden)).reshape(1, hid_pad)
    b2 = jnp.pad(params["b2"], (0, hid_pad - hidden)).reshape(1, hid_pad)
    w3 = jnp.pad(params["w3"].reshape(1, hidden),
                 ((0, 0), (0, hid_pad - hidden)))
    b3 = params["b3"].reshape(1, 1)
    return {
        "prepared": True, "input_dim": input_dim, "hidden": hidden,
        "in_pad": in_pad, "hid_pad": hid_pad,
        "w1": w1, "b1": b1.astype(jnp.float32),
        "w2": w2, "b2": b2.astype(jnp.float32),
        "w3": w3.astype(jnp.float32), "b3": b3.astype(jnp.float32),
    }


# --------------------------------------------------------------------------
# Forward
# --------------------------------------------------------------------------
def time_discriminator_forward(x, params, alpha=1.0):
    """Pallas forward of TimeDiscriminator.

    Args:
      x: [batch, input_dim] float32 time-domain features.
      params: raw params dict (w1 [in,hid], b1 [hid], w2 [hid,hid], b2 [hid],
              w3 [hid,1], b3 [1]) or the output of prepare_params().
      alpha: gradient-reversal scale (forward is identity; kept for API parity).
    Returns:
      domain_pred: [batch, 1] float32.
    """
    del alpha  # GradientReversalLayer.forward is identity.
    # NOTE: for tiny batch/hidden (like the smoke test below) this is launch-
    # overhead bound and plain XLA would be as fast — dispatch accordingly in
    # production; we always take the Pallas path here to exercise the kernel.
    params = prepare_params(params)
    batch, input_dim = x.shape
    assert input_dim == params["input_dim"], (input_dim, params["input_dim"])
    in_pad, hid_pad = params["in_pad"], params["hid_pad"]

    aligned = (in_pad == input_dim) and (batch % 8 == 0)
    x_bytes = 4 if aligned else 2

    vmem_capacity = _vmem_capacity_bytes()
    tb, vmem_limit = _select_batch_tile(batch, in_pad, hid_pad, x_bytes,
                                        vmem_capacity)
    batch_pad = _round_up(batch, tb)
    n_tiles = batch_pad // tb

    if aligned and batch_pad == batch:
        xp = x  # pass f32 straight through; kernel casts to bf16 in-flight.
    else:
        # Single fused wrapper op: pad + halve the x HBM read via bf16.
        xp = jnp.pad(x, ((0, batch_pad - batch),
                         (0, in_pad - input_dim))).astype(jnp.bfloat16)

    out = pl.pallas_call(
        _time_disc_kernel,
        grid=(n_tiles,),
        out_shape=jax.ShapeDtypeStruct((batch_pad, 1), jnp.float32),
        in_specs=[
            pl.BlockSpec((tb, in_pad), lambda i: (i, 0)),   # x (streamed)
            _const_spec((in_pad, hid_pad)),                 # w1 (resident)
            _const_spec((1, hid_pad)),                      # b1
            _const_spec((hid_pad, hid_pad)),                # w2
            _const_spec((1, hid_pad)),                      # b2
            _const_spec((1, hid_pad)),                      # w3 (row)
            _const_spec((1, 1)),                            # b3
        ],
        out_specs=pl.BlockSpec((tb, 1), lambda i: (i, 0)),  # narrow output
        compiler_params=pltpu.CompilerParams(
            dimension_semantics=("parallel",),
            vmem_limit_bytes=vmem_limit,
        ),
    )(xp, params["w1"], params["b1"], params["w2"], params["b2"],
      params["w3"], params["b3"])

    return out[:batch] if batch_pad != batch else out


# --------------------------------------------------------------------------
# Params init / reference / smoke test
# --------------------------------------------------------------------------
def init_params(key, input_dim, hidden_dim=None):
    """Deterministic init (PyTorch Linear shapes, stored [in, out])."""
    if hidden_dim is None:
        hidden_dim = input_dim * 2
    k1, k2, k3, k4, k5, k6 = jax.random.split(key, 6)
    s1 = 1.0 / jnp.sqrt(input_dim)
    s2 = 1.0 / jnp.sqrt(hidden_dim)
    return {
        "w1": jax.random.uniform(k1, (input_dim, hidden_dim), jnp.float32, -s1, s1),
        "b1": jax.random.uniform(k2, (hidden_dim,), jnp.float32, -s1, s1),
        "w2": jax.random.uniform(k3, (hidden_dim, hidden_dim), jnp.float32, -s2, s2),
        "b2": jax.random.uniform(k4, (hidden_dim,), jnp.float32, -s2, s2),
        "w3": jax.random.uniform(k5, (hidden_dim, 1), jnp.float32, -s2, s2),
        "b3": jax.random.uniform(k6, (1,), jnp.float32, -s2, s2),
    }


def _reference_forward(x, params):
    h1 = _leaky_relu(x @ params["w1"] + params["b1"])
    h2 = _leaky_relu(h1 @ params["w2"] + params["b2"])
    return h2 @ params["w3"] + params["b3"]


if __name__ == "__main__":
    key = jax.random.PRNGKey(0)
    kx, kp = jax.random.split(key)

    batch, input_dim = 8, 32          # hidden_dim defaults to input_dim*2 = 64
    x = jax.random.normal(kx, (batch, input_dim), jnp.float32)
    raw_params = init_params(kp, input_dim)

    # Hoisted one-time weight pad + bf16 cast (reused across calls).
    params = prepare_params(raw_params)

    out = time_discriminator_forward(x, params, alpha=1.0)
    out = jax.block_until_ready(out)

    ref = _reference_forward(x, raw_params)
    assert out.shape == (batch, 1), out.shape
    # bf16 MXU operands (f32 accumulate) -> ~1e-3 relative deviation vs f32 ref.
    assert jnp.allclose(out, ref, atol=3e-2, rtol=3e-2), (out, ref)

    print("KERNEL_OK")
</pallas_src>

<mosaic_0001>
module attributes {stable_mosaic.version = 11 : i64} {
  func.func @_time_disc_kernel(%arg0: i32, %arg1: memref<8x128xbf16, #tpu.memory_space<vmem>>, %arg2: memref<128x128xbf16, #tpu.memory_space<vmem>>, %arg3: memref<1x128xf32, #tpu.memory_space<vmem>>, %arg4: memref<128x128xbf16, #tpu.memory_space<vmem>>, %arg5: memref<1x128xf32, #tpu.memory_space<vmem>>, %arg6: memref<1x128xf32, #tpu.memory_space<vmem>>, %arg7: memref<1x1xf32, #tpu.memory_space<vmem>>, %arg8: memref<8x1xf32, #tpu.memory_space<vmem>>) attributes {dimension_semantics = [#tpu.dimension_semantics<parallel>], iteration_bounds = array<i64: 1>, scalar_prefetch = 0 : i64, scratch_operands = 0 : i64, tpu.core_type = #tpu.core_type<tc>, window_params = [{transform_indices = @transform_0, window_bounds = array<i64: 8, 128>}, {pipeline_mode = #tpu.pipeline_mode<synchronous>, transform_indices = @transform_1, window_bounds = array<i64: 128, 128>}, {pipeline_mode = #tpu.pipeline_mode<synchronous>, transform_indices = @transform_2, window_bounds = array<i64: 1, 128>}, {pipeline_mode = #tpu.pipeline_mode<synchronous>, transform_indices = @transform_3, window_bounds = array<i64: 128, 128>}, {pipeline_mode = #tpu.pipeline_mode<synchronous>, transform_indices = @transform_4, window_bounds = array<i64: 1, 128>}, {pipeline_mode = #tpu.pipeline_mode<synchronous>, transform_indices = @transform_5, window_bounds = array<i64: 1, 128>}, {pipeline_mode = #tpu.pipeline_mode<synchronous>, transform_indices = @transform_6, window_bounds = array<i64: 1, 1>}, {transform_indices = @transform_7, window_bounds = array<i64: 8, 1>}]} {
    %c0 = arith.constant 0 : index
    %c0_0 = arith.constant 0 : index
    %0 = vector.load %arg1[%c0, %c0_0] : memref<8x128xbf16, #tpu.memory_space<vmem>>, vector<8x128xbf16>
    %c0_1 = arith.constant 0 : index
    %c0_2 = arith.constant 0 : index
    %1 = vector.load %arg2[%c0_1, %c0_2] : memref<128x128xbf16, #tpu.memory_space<vmem>>, vector<128x128xbf16>
    %cst = arith.constant dense<0.000000e+00> : vector<8x128xf32>
    %2 = tpu.matmul %0, %1, %cst {dimension_numbers = #tpu.dot_dimension_numbers<[1], [0], [0], [1], [0, 0, 1, 1], [], []>} : vector<8x128xbf16>, vector<128x128xbf16>, vector<8x128xf32> -> vector<8x128xf32>
    %c0_3 = arith.constant 0 : index
    %c0_4 = arith.constant 0 : index
    %3 = vector.load %arg3[%c0_3, %c0_4] : memref<1x128xf32, #tpu.memory_space<vmem>>, vector<1x128xf32>
    %4 = vector.broadcast %3 : vector<1x128xf32> to vector<8x128xf32>
    %5 = arith.addf %2, %4 : vector<8x128xf32>
    %cst_5 = arith.constant 0.000000e+00 : f32
    %6 = vector.broadcast %cst_5 : f32 to vector<8x128xf32>
    %7 = arith.cmpf oge, %5, %6 : vector<8x128xf32>
    %cst_6 = arith.constant 2.000000e-01 : f32
    %8 = vector.broadcast %cst_6 : f32 to vector<8x128xf32>
    %9 = arith.mulf %8, %5 : vector<8x128xf32>
    %10 = arith.select %7, %5, %9 : vector<8x128xi1>, vector<8x128xf32>
    %11 = arith.truncf %10 : vector<8x128xf32> to vector<8x128xbf16>
    %c0_7 = arith.constant 0 : index
    %c0_8 = arith.constant 0 : index
    %12 = vector.load %arg4[%c0_7, %c0_8] : memref<128x128xbf16, #tpu.memory_space<vmem>>, vector<128x128xbf16>
    %cst_9 = arith.constant dense<0.000000e+00> : vector<8x128xf32>
    %13 = tpu.matmul %11, %12, %cst_9 {dimension_numbers = #tpu.dot_dimension_numbers<[1], [0], [0], [1], [0, 0, 1, 1], [], []>} : vector<8x128xbf16>, vector<128x128xbf16>, vector<8x128xf32> -> vector<8x128xf32>
    %c0_10 = arith.constant 0 : index
    %c0_11 = arith.constant 0 : index
    %14 = vector.load %arg5[%c0_10, %c0_11] : memref<1x128xf32, #tpu.memory_space<vmem>>, vector<1x128xf32>
    %15 = vector.broadcast %14 : vector<1x128xf32> to vector<8x128xf32>
    %16 = arith.addf %13, %15 : vector<8x128xf32>
    %cst_12 = arith.constant 0.000000e+00 : f32
    %17 = vector.broadcast %cst_12 : f32 to vector<8x128xf32>
    %18 = arith.cmpf oge, %16, %17 : vector<8x128xf32>
    %cst_13 = arith.constant 2.000000e-01 : f32
    %19 = vector.broadcast %cst_13 : f32 to vector<8x128xf32>
    %20 = arith.mulf %19, %16 : vector<8x128xf32>
    %21 = arith.select %18, %16, %20 : vector<8x128xi1>, vector<8x128xf32>
    %c0_14 = arith.constant 0 : index
    %c0_15 = arith.constant 0 : index
    %22 = vector.load %arg6[%c0_14, %c0_15] : memref<1x128xf32, #tpu.memory_space<vmem>>, vector<1x128xf32>
    %23 = vector.broadcast %22 : vector<1x128xf32> to vector<8x128xf32>
    %24 = arith.mulf %21, %23 : vector<8x128xf32>
    %cst_16 = arith.constant dense<0.000000e+00> : vector<8xf32>
    %25 = vector.multi_reduction <add>, %24, %cst_16 [1] : vector<8x128xf32> to vector<8xf32>
    %26 = vector.shape_cast %25 : vector<8xf32> to vector<8x1xf32>
    %c0_17 = arith.constant 0 : index
    %c0_18 = arith.constant 0 : index
    %27 = vector.load %arg7[%c0_17, %c0_18] : memref<1x1xf32, #tpu.memory_space<vmem>>, vector<1x1xf32>
    %28 = vector.broadcast %27 : vector<1x1xf32> to vector<8x1xf32>
    %29 = arith.addf %26, %28 : vector<8x1xf32>
    %c0_19 = arith.constant 0 : index
    %c0_20 = arith.constant 0 : index
    %30 = vector.load %arg8[%c0_19, %c0_20] : memref<8x1xf32, #tpu.memory_space<vmem>>, vector<8x1xf32>
    tpu.vector_store %arg8[%c0_19, %c0_20], %29 {strides = array<i32>} : memref<8x1xf32, #tpu.memory_space<vmem>>, vector<8x1xf32>,
    return
  }
  func.func @transform_0(%arg0: i32) -> (i32, i32) {
    %c0_i32 = arith.constant 0 : i32
    %c0_i32_0 = arith.constant 0 : i32
    return %arg0, %c0_i32 : i32, i32
  }
  func.func @transform_1(%arg0: i32) -> (i32, i32) {
    %c0_i32 = arith.constant 0 : i32
    %c0_i32_0 = arith.constant 0 : i32
    %c0_i32_1 = arith.constant 0 : i32
    return %c0_i32, %c0_i32_0 : i32, i32
  }
  func.func @transform_2(%arg0: i32) -> (i32, i32) {
    %c0_i32 = arith.constant 0 : i32
    %c0_i32_0 = arith.constant 0 : i32
    %c0_i32_1 = arith.constant 0 : i32
    return %c0_i32, %c0_i32_0 : i32, i32
  }
  func.func @transform_3(%arg0: i32) -> (i32, i32) {
    %c0_i32 = arith.constant 0 : i32
    %c0_i32_0 = arith.constant 0 : i32
    %c0_i32_1 = arith.constant 0 : i32
    return %c0_i32, %c0_i32_0 : i32, i32
  }
  func.func @transform_4(%arg0: i32) -> (i32, i32) {
    %c0_i32 = arith.constant 0 : i32
    %c0_i32_0 = arith.constant 0 : i32
    %c0_i32_1 = arith.constant 0 : i32
    return %c0_i32, %c0_i32_0 : i32, i32
  }
  func.func @transform_5(%arg0: i32) -> (i32, i32) {
    %c0_i32 = arith.constant 0 : i32
    %c0_i32_0 = arith.constant 0 : i32
    %c0_i32_1 = arith.constant 0 : i32
    return %c0_i32, %c0_i32_0 : i32, i32
  }
  func.func @transform_6(%arg0: i32) -> (i32, i32) {
    %c0_i32 = arith.constant 0 : i32
    %c0_i32_0 = arith.constant 0 : i32
    %c0_i32_1 = arith.constant 0 : i32
    return %c0_i32, %c0_i32_0 : i32, i32
  }
  func.func @transform_7(%arg0: i32) -> (i32, i32) {
    %c0_i32 = arith.constant 0 : i32
    %c0_i32_0 = arith.constant 0 : i32
    return %arg0, %c0_i32 : i32, i32
  }
}

</mosaic_0001>

<bundles_post_ra>
// kernel: tpu_custom_call.1
= control target key start
LH: loop header
LB: loop body
LE: loop exit
PB: predicated region body
PF: predicated region fallthrough
CT: control target
= control target key end

     0   :  { %s599_s0 = inlined_call_operand.hbm [shape: bf16[8,128], index: 0, kind: input, shape index: {}]   ;;  %s600_s1 = inlined_call_operand.hbm [shape: bf16[128,128], index: 1, kind: input, shape index: {}]   ;;  %s601_s2 = inlined_call_operand.vmem [shape: f32[1,128], index: 2, kind: input, shape index: {}]   ;;  %s602_s3 = inlined_call_operand.hbm [shape: bf16[128,128], index: 3, kind: input, shape index: {}]   ;;  %s603_s4 = inlined_call_operand.vmem [shape: f32[1,128], index: 4, kind: input, shape index: {}]   ;;  %s604_s5 = inlined_call_operand.vmem [shape: f32[1,128], index: 5, kind: input, shape index: {}]   ;;  %s605_s6 = inlined_call_operand.<no memory space> [shape: f32[1,1], index: 6, kind: input, shape index: {}]   ;;  %s606_s7 = inlined_call_operand.vmem [shape: f32[8,1], index: 7, kind: output, shape index: {}]  }
   0x1   :  { %v12_v0 = vstv %s605_s6 }
   0x2   :  { %13 = vst [vmem:[#allocation2] sm:$0x1] %v12_v0 }
   0x3   :  { %14 = vsyncpa [#allocation4], 0 }
   0x4   :  { %15 = vsyncpa [#allocation6], 0  ;;  %s495_s26 = smov [#allocation5]   ;;  %s425_s30 = scalar_lea.hbm %s600_s1, 1024 }
   0x5   :  { %s31_s27 = sshll.u32 %s495_s26, 4  ;;  %p426_p0 = scmp.ne.s32.totalorder %s600_s1, %s425_s30  ;;  %s32_s27 = int_to_ptr.vmem [resolvable:$true] %s31_s27 }
   0x6   :  { %p429_p1 = scmp.lt.u32.totalorder %s425_s30, %s600_s1 }
   0x8   :  { %p431_p2 = pnand %p429_p1, %p426_p0 }
   0xa   :  { %434 = shalt.err (!%p431_p2)
}
   0xb   :  { %s435_s6 = scalar_lea.vmem %s32_s27, 1024  ;;  %p440_p4 = scmp.lt.s32.totalorder %s32_s27, %s32_s27 }
   0xc   :  { %p436_p3 = scmp.ne.s32.totalorder %s32_s27, %s435_s6  ;;  %p441_p5 = scmp.lt.s32.totalorder %s435_s6, %s435_s6 }
   0xe   :  { %p442_p6 = por %p441_p5, %p440_p4 }
  0x10   :  { %p443_p7 = pnand %p442_p6, %p436_p3 }
  0x12   :  { %446 = shalt.err (!%p443_p7)
}
  0x13   :  { %s496_s12 = smov 64   ;;  %s497_s13 = smov 4  }
  0x14   :  { %37 = dma.hbm_to_vmem [thread:$0]  %s600_s1, 1024, %s32_s27, [#allocation6], %s496_s12, %s496_s12, %s497_s13  }
  0x15   :  { %s498_s16 = smov [#allocation3]   ;;  %s499_s18 = smov [#allocation7]  }
  0x16   :  { %s22_s17 = sshll.u32 %s498_s16, 4  ;;  %s45_s19 = sshll.u32 %s499_s18, 4  ;;  %s23_s17 = int_to_ptr.vmem [resolvable:$true] %s22_s17  ;;  %s46_s19 = int_to_ptr.vmem [resolvable:$true] %s45_s19 }
  0x17   :  { %s447_s22 = scalar_lea.hbm %s599_s0, 64 }
  0x18   :  { %p448_p8 = scmp.ne.s32.totalorder %s599_s0, %s447_s22  ;;  %p451_p9 = scmp.lt.u32.totalorder %s447_s22, %s599_s0 }
  0x1a   :  { %p453_p10 = pnand %p451_p9, %p448_p8 }
  0x1c   :  { %456 = shalt.err (!%p453_p10)
}
  0x1d   :  { %s457_s1 = scalar_lea.vmem %s23_s17, 64  ;;  %p462_p12 = scmp.lt.s32.totalorder %s23_s17, %s23_s17 }
  0x1e   :  { %p458_p11 = scmp.ne.s32.totalorder %s23_s17, %s457_s1  ;;  %p463_p13 = scmp.lt.s32.totalorder %s457_s1, %s457_s1 }
  0x20   :  { %p464_p0 = por %p463_p13, %p462_p12 }
  0x22   :  { %p465_p1 = pnand %p464_p0, %p458_p11 }
  0x24   :  { %468 = shalt.err (!%p465_p1)
}
  0x25   :  { %25 = dma.hbm_to_vmem [thread:$0]  %s599_s0, 64, %s23_s17, [#allocation4]  }
  0x26   :  { %s469_s8 = scalar_lea.hbm %s602_s3, 1024 }
  0x27   :  { %p470_p2 = scmp.ne.s32.totalorder %s602_s3, %s469_s8  ;;  %p473_p3 = scmp.lt.u32.totalorder %s469_s8, %s602_s3 }
  0x29   :  { %p475_p4 = pnand %p473_p3, %p470_p2 }
  0x2b   :  { %478 = shalt.err (!%p475_p4)
}
  0x2c   :  { %s479_s14 = scalar_lea.vmem %s46_s19, 1024  ;;  %p484_p6 = scmp.lt.s32.totalorder %s46_s19, %s46_s19 }
  0x2d   :  { %p480_p5 = scmp.ne.s32.totalorder %s46_s19, %s479_s14  ;;  %p485_p7 = scmp.lt.s32.totalorder %s479_s14, %s479_s14 }
  0x2f   :  { %p486_p8 = por %p485_p7, %p484_p6 }
  0x31   :  { %p487_p9 = pnand %p486_p8, %p480_p5 }
  0x33   :  { %490 = shalt.err (!%p487_p9)
}
  0x34   :  { %51 = dma.hbm_to_vmem [thread:$0]  %s602_s3, 1024, %s46_s19, [#allocation6], %s496_s12, %s496_s12, %s497_s13  }
  0x35   :  { %491 = dma.done.wait [#allocation4], 64  }
  0x36   :  { %492 = vsyncadd [#allocation4], 4294967232 }
  0x37   :  { %493 = dma.done.wait [#allocation6], 2048  }
  0x38   :  { %494 = vsyncadd [#allocation6], 4294965248  ;;  %v500_v1 = vmov 0.0   ;;  %vm501_vm0 = vmmov 0   ;;  %v409_v2 = vld [vmem:[#allocation5] sm:$0xff]   ;;  %v410_v3 = vld [vmem:[#allocation5 + $0x8] sm:$0xff]  }
  0x39   :  { %362 = vmatprep.subr.bf16.mxu0 %v500_v1  ;;  %378 = vmatprep.mubr.msk.bf16.mxu0 %vm501_vm0, %v500_v1  ;;  %v411_v4 = vld [vmem:[#allocation5 + $0x10] sm:$0xff]   ;;  %v417_v5 = vld [vmem:[#allocation7] sm:$0xff]   ;;  %v412_v6 = vld [vmem:[#allocation5 + $0x18] sm:$0xff]   ;;  %vm316_vm3 = vcmask 7168  }
  0x3a   :  { %382 = vmatprep.subr.bf16.mxu1 %v500_v1  ;;  %398 = vmatprep.mubr.msk.bf16.mxu1 %vm501_vm0, %v500_v1  ;;  %v418_v7 = vld [vmem:[#allocation7 + $0x8] sm:$0xff]   ;;  %v413_v8 = vld [vmem:[#allocation5 + $0x20] sm:$0xff]   ;;  %v419_v9 = vld [vmem:[#allocation7 + $0x10] sm:$0xff]  }
  0x3b   :  { %363 = vmatpush3.bf16.msra.mxu0 %v409_v2  ;;  %383 = vmatpush3.bf16.msra.mxu1 %v417_v5  ;;  %v414_v10 = vld [vmem:[#allocation5 + $0x28] sm:$0xff]   ;;  %v420_v11 = vld [vmem:[#allocation7 + $0x18] sm:$0xff]   ;;  %v415_v12 = vld [vmem:[#allocation5 + $0x30] sm:$0xff]  }
  0x3c   :  { %364 = vmatprep.subr.bf16.mxu0 %v500_v1  ;;  %384 = vmatprep.subr.bf16.mxu1 %v500_v1  ;;  %v421_v13 = vld [vmem:[#allocation7 + $0x20] sm:$0xff]   ;;  %v416_v14 = vld [vmem:[#allocation5 + $0x38] sm:$0xff]   ;;  %v422_v15 = vld [vmem:[#allocation7 + $0x28] sm:$0xff]  }
  0x3d   :  { %v68_v16 = vld [vmem:[#allocation3] sm:$0xf]  ;;  %v423_v17 = vld [vmem:[#allocation7 + $0x30] sm:$0xff]   ;;  %v324_v19 = vld [vmem:[%s601_s2] ss:$0 sm:$0xff] }
  0x3e   :  { %v424_v18 = vld [vmem:[#allocation7 + $0x38] sm:$0xff]  }
  0x3f   :  { %365 = vmatpush3.bf16.msra.mxu0 %v410_v3  ;;  %385 = vmatpush3.bf16.msra.mxu1 %v418_v7  ;;  %v333_v28 = vld [vmem:[%s603_s4] ss:$0 sm:$0xff] }
  0x40   :  { %366 = vmatprep.subr.bf16.mxu0 %v500_v1  ;;  %386 = vmatprep.subr.bf16.mxu1 %v500_v1  ;;  %v342_v35 = vld [vmem:[%s604_s5] ss:$0 sm:$0xff] }
  0x41   :  { %v343_v38 = vld [vmem:[#allocation2] ss:$0 sm:$0xff] }
  0x43   :  { %367 = vmatpush3.bf16.msra.mxu0 %v411_v4  ;;  %387 = vmatpush3.bf16.msra.mxu1 %v419_v9 }
  0x44   :  { %368 = vmatprep.subr.bf16.mxu0 %v500_v1  ;;  %388 = vmatprep.subr.bf16.mxu1 %v500_v1 }
  0x47   :  { %369 = vmatpush3.bf16.msra.mxu0 %v412_v6  ;;  %389 = vmatpush3.bf16.msra.mxu1 %v420_v11 }
  0x48   :  { %370 = vmatprep.subr.bf16.mxu0 %v500_v1  ;;  %390 = vmatprep.subr.bf16.mxu1 %v500_v1 }
  0x4b   :  { %371 = vmatpush3.bf16.msra.mxu0 %v413_v8  ;;  %391 = vmatpush3.bf16.msra.mxu1 %v421_v13 }
  0x4c   :  { %372 = vmatprep.subr.bf16.mxu0 %v500_v1  ;;  %392 = vmatprep.subr.bf16.mxu1 %v500_v1 }
  0x4f   :  { %373 = vmatpush3.bf16.msra.mxu0 %v414_v10  ;;  %393 = vmatpush3.bf16.msra.mxu1 %v422_v15 }
  0x50   :  { %374 = vmatprep.subr.bf16.mxu0 %v500_v1  ;;  %394 = vmatprep.subr.bf16.mxu1 %v500_v1 }
  0x53   :  { %375 = vmatpush3.bf16.msra.mxu0 %v415_v12  ;;  %395 = vmatpush3.bf16.msra.mxu1 %v423_v17 }
  0x54   :  { %376 = vmatprep.subr.bf16.mxu0 %v500_v1  ;;  %396 = vmatprep.subr.bf16.mxu1 %v500_v1 }
  0x57   :  { %377 = vmatpush3.bf16.msra.mxu0 %v416_v14  ;;  %397 = vmatpush3.bf16.msra.mxu1 %v424_v18 }
  0x5a   :  { %379 = vmatmul.mubr.bf16.vlgmr.msra.gmra.mrb[0].mxu0 %v68_v16 }
 0x12d   :  { %v174_v20 = vpop.f32.mrb[0].mxu0 }
 0x12e   :  { %v175_v21 = vadd.f32 %v324_v19, %v174_v20  ;;  %v380_v22 = vpop.f32.mrb[1].mxu0 }
 0x12f   :  { %v177_v23 = vpop.f32.mrb[2].mxu0 }
 0x130   :  { %vm180_vm1 = vcmp.ge.f32.partialorder %v175_v21, 0.0  ;;  %v181_v24 = vmul.f32 0.2, %v175_v21  ;;  %v381_v25 = vpop.f32.mrb[3].mxu0 }
 0x132   :  { %v182_v26 = vsel %vm180_vm1, %v175_v21, %v181_v24 }
 0x133   :  { %v183_v27 = vpack.c.bf16 %v182_v26, %v182_v26 }
 0x135   :  { %399 = vmatmul.mubr.bf16.vlgmr.msra.gmra.mrb[0].mxu1 %v183_v27 }
 0x208   :  { %v289_v29 = vpop.f32.mrb[0].mxu1 }
 0x209   :  { %v290_v30 = vadd.f32 %v333_v28, %v289_v29  ;;  %v400_v31 = vpop.f32.mrb[1].mxu1 }
 0x20a   :  { %v292_v32 = vpop.f32.mrb[2].mxu1 }
 0x20b   :  { %v296_v33 = vmul.f32 0.2, %v290_v30  ;;  %v401_v34 = vpop.f32.mrb[3].mxu1  ;;  %vm295_vm2 = vcmp.ge.f32.partialorder %v290_v30, 0.0 }
 0x20d   :  { %v297_v36 = vsel %vm295_vm2, %v290_v30, %v296_v33 }
 0x20e   :  { %v305_v37 = vmul.f32 %v342_v35, %v297_v36 }
 0x210   :  { %306 = vadd.xlane.f32.xlu0 %v305_v37 }
 0x29d   :  { %v307_v39 = vpop.xlane.xlu0 %306 }
 0x29e   :  { %v315_v40 = vadd.f32 %v343_v38, %v307_v39 }
 0x2a0   :  { %317 = vst.msk [vmem:[%s606_s7] sm:$0xff] %vm316_vm3, %v315_v40 }
 0x2a1   :  { %322 = vsyncpa [#allocation4], 1 }
 0x2a2   :  { %323 = vsyncpa [#allocation6], 1 }

</bundles_post_ra>
